<compile_context>
chip_gen: v7x
topology: tpu7x:2x2x1
jax: 0.10.0
libtpu: 0.0.40
codegen_flags: <defaults>
</compile_context>

<pallas_src>
import functools
import math

import jax
import jax.numpy as jnp
from jax.experimental import pallas as pl
from jax.experimental.pallas import tpu as pltpu


def _lt2d_pool_kernel(x_ref, w_ref, b_ref, o_ref, acc_ref, *, inv_hw):
    # x_ref:   (TILE_N, C, HW_TILE) input tile, native dtype
    # w_ref:   (C, F_pad)           resident conv1x1 weight (transposed, padded)
    # b_ref:   (1, F_pad)           resident bias row
    # o_ref:   (TILE_N, F_pad)      lane-dense output tile
    # acc_ref: (TILE_N, C) f32      running sum over the HW reduction axis
    hw_i = pl.program_id(1)

    @pl.when(hw_i == 0)
    def _():
        acc_ref[...] = jnp.zeros_like(acc_ref)

    # f32 accumulation of the spatial sum (XLU lane reduce; kernel is HBM-bound
    # on reading x, so this is hidden under the DMA).
    acc_ref[...] += jnp.sum(x_ref[...].astype(jnp.float32), axis=-1)

    @pl.when(hw_i == pl.num_programs(1) - 1)
    def _():
        pooled = acc_ref[...] * inv_hw  # (TILE_N, C), global average pool
        o_ref[...] = (
            jnp.dot(
                pooled,
                w_ref[...].astype(jnp.float32),
                preferred_element_type=jnp.float32,
            )
            + b_ref[...].astype(jnp.float32)
        ).astype(o_ref.dtype)


def _choose_tile_n(n):
    """Batch tile: whole batch when tiny; otherwise a multiple of 8 capped at
    256 and sized so the batch grid has >= 2 steps (keeps both v7x TensorCores
    busy via the 'parallel' batch axis; harmless on single-TC v5e/v6e)."""
    if n <= 8:
        return n
    half = (n + 1) // 2
    return min(256, ((half + 7) // 8) * 8)


def _choose_hw_tile(tile_n, c, hw, itemsize, budget=2 << 20):
    """HW tile for the reduction grid axis.  Must divide hw exactly (OOB reads
    on a reduction axis would corrupt the accumulated sum) and be a multiple of
    128 unless it is hw itself; sized so one x block stays within ~budget bytes
    per buffer (Pallas double-buffers it), well inside v5e's 16 MiB scoped
    default and v7x's 32 MiB scoped / 64 MiB physical VMEM."""
    if tile_n * c * hw * itemsize <= budget or hw % 128 != 0:
        return hw
    max_tile = max(128, (budget // max(1, tile_n * c * itemsize)) // 128 * 128)
    t = min(hw // 128 * 128, max_tile)
    while t >= 128:
        if hw % t == 0:
            return t
        t -= 128
    return hw
    # TODO(synk): for very large C (x block still over budget with hw_tile=128),
    # additionally tile C or raise vmem_limit_bytes in CompilerParams.


def linear_transform_2d(x_nchw, weight_fc, bias_f):
    """x_nchw: (N, C, H, W); weight_fc: (F, C) (conv1x1 weight squeezed);
    bias_f: (F,). Returns (N, F) float32 == conv1x1 -> global avg pool -> flatten."""
    n, c, h, w = x_nchw.shape
    f = weight_fc.shape[0]
    hw = h * w

    # Lane-dense feature dim: pad F up to a multiple of 128 (tiny params only).
    f_pad = ((f + 127) // 128) * 128
    w_cf = jnp.pad(weight_fc.T, ((0, 0), (0, f_pad - f)))           # (C, F_pad)
    b_row = jnp.pad(bias_f, (0, f_pad - f)).reshape(1, f_pad)       # (1, F_pad)

    # (N, C, H, W) -> (N, C, HW): collapses contiguous dims, no data movement,
    # no dtype change -- x streams to the kernel in its native dtype.
    x3 = x_nchw.reshape(n, c, hw)
    itemsize = x3.dtype.itemsize

    tile_n = _choose_tile_n(n)
    hw_tile = _choose_hw_tile(tile_n, c, hw, itemsize)
    grid_n = pl.cdiv(n, tile_n)      # ragged final batch block is masked by Pallas
    grid_hw = hw // hw_tile          # exact by construction

    kernel = functools.partial(_lt2d_pool_kernel, inv_hw=1.0 / float(hw))

    out_padded = pl.pallas_call(
        kernel,
        out_shape=jax.ShapeDtypeStruct((n, f_pad), jnp.float32),
        grid_spec=pltpu.PrefetchScalarGridSpec(
            num_scalar_prefetch=0,
            grid=(grid_n, grid_hw),
            in_specs=[
                pl.BlockSpec((tile_n, c, hw_tile), lambda i, j: (i, 0, j)),
                pl.BlockSpec((c, f_pad), lambda i, j: (0, 0)),   # resident weight
                pl.BlockSpec((1, f_pad), lambda i, j: (0, 0)),   # resident bias
            ],
            out_specs=pl.BlockSpec((tile_n, f_pad), lambda i, j: (i, 0)),
            scratch_shapes=[pltpu.VMEM((tile_n, c), jnp.float32)],
        ),
        compiler_params=pltpu.CompilerParams(
            dimension_semantics=("parallel", "arbitrary"),
        ),
        cost_estimate=pl.CostEstimate(
            flops=n * c * hw + 2 * n * c * f,
            transcendentals=0,
            bytes_accessed=(
                n * c * hw * itemsize            # x (dominant, unavoidable)
                + (c + 1) * f_pad * 4            # weight + bias
                + n * f_pad * 4                  # output
            ),
        ),
    )(x3, w_cf, b_row)

    return out_padded[:, :f]


if __name__ == "__main__":
    # Small shapes consistent with the module: batch=2, in_channels=4,
    # spatial=16x16, feature_length=32.
    N, C, H, W = 2, 4, 16, 16
    F_LEN = 32

    key = jax.random.PRNGKey(0)
    kx, kw, kb = jax.random.split(key, 3)

    x = jax.random.normal(kx, (N, C, H, W), dtype=jnp.float32)

    # Deterministic parameter init mimicking PyTorch Conv2d defaults
    # (kaiming-uniform-ish bounds); fan_in = C * 1 * 1.
    fan_in = C
    w_bound = math.sqrt(1.0 / fan_in) * math.sqrt(3.0)
    b_bound = 1.0 / math.sqrt(fan_in)
    weight = jax.random.uniform(kw, (F_LEN, C), jnp.float32, -w_bound, w_bound)
    bias = jax.random.uniform(kb, (F_LEN,), jnp.float32, -b_bound, b_bound)

    out = linear_transform_2d(x, weight, bias)
    out = jax.block_until_ready(out)

    # Pure-JAX reference: conv1x1 + global avg pool + flatten.
    ref = jnp.einsum("nchw,fc->nf", x, weight) / (H * W) + bias[None, :]
    assert out.shape == (N, F_LEN)
    assert jnp.allclose(out, ref, atol=1e-4, rtol=1e-4)

    print("KERNEL_OK")
</pallas_src>

<mosaic_0001>
module attributes {stable_mosaic.version = 11 : i64} {
  func.func @_lt2d_pool_kernel(%arg0: i32, %arg1: i32, %arg2: memref<2x4x256xf32, #tpu.memory_space<vmem>>, %arg3: memref<4x128xf32, #tpu.memory_space<vmem>>, %arg4: memref<1x128xf32, #tpu.memory_space<vmem>>, %arg5: memref<2x128xf32, #tpu.memory_space<vmem>>, %arg6: memref<2x4xf32, #tpu.memory_space<vmem>>) attributes {dimension_semantics = [#tpu.dimension_semantics<parallel>, #tpu.dimension_semantics<arbitrary>], iteration_bounds = array<i64: 1, 1>, scalar_prefetch = 0 : i64, scratch_operands = 1 : i64, tpu.core_type = #tpu.core_type<tc>, window_params = [{transform_indices = @transform_0, window_bounds = array<i64: 2, 4, 256>}, {pipeline_mode = #tpu.pipeline_mode<synchronous>, transform_indices = @transform_1, window_bounds = array<i64: 4, 128>}, {pipeline_mode = #tpu.pipeline_mode<synchronous>, transform_indices = @transform_2, window_bounds = array<i64: 1, 128>}, {transform_indices = @transform_3, window_bounds = array<i64: 2, 128>}]} {
    %c0_i32 = arith.constant 0 : i32
    %0 = arith.cmpi eq, %arg1, %c0_i32 : i32
    %1 = arith.extui %0 : i1 to i32
    %c0_i32_0 = arith.constant 0 : i32
    %2 = arith.cmpi ne, %1, %c0_i32_0 : i32
    scf.if %2 {
      %cst_9 = arith.constant 0.000000e+00 : f32
      %11 = vector.broadcast %cst_9 : f32 to vector<2x4xf32>
      %c0_10 = arith.constant 0 : index
      %c0_11 = arith.constant 0 : index
      %12 = vector.load %arg6[%c0_10, %c0_11] : memref<2x4xf32, #tpu.memory_space<vmem>>, vector<2x4xf32>
      tpu.vector_store %arg6[%c0_10, %c0_11], %11 {strides = array<i32>} : memref<2x4xf32, #tpu.memory_space<vmem>>, vector<2x4xf32>,
    } else {
    }
    %c0 = arith.constant 0 : index
    %c0_1 = arith.constant 0 : index
    %3 = vector.load %arg6[%c0, %c0_1] : memref<2x4xf32, #tpu.memory_space<vmem>>, vector<2x4xf32>
    %c0_2 = arith.constant 0 : index
    %c0_3 = arith.constant 0 : index
    %c0_4 = arith.constant 0 : index
    %4 = vector.load %arg2[%c0_2, %c0_3, %c0_4] : memref<2x4x256xf32, #tpu.memory_space<vmem>>, vector<2x4x256xf32>
    %cst = arith.constant dense<0.000000e+00> : vector<2x4xf32>
    %5 = vector.multi_reduction <add>, %4, %cst [2] : vector<2x4x256xf32> to vector<2x4xf32>
    %6 = arith.addf %3, %5 : vector<2x4xf32>
    %c0_5 = arith.constant 0 : index
    %c0_6 = arith.constant 0 : index
    %7 = vector.load %arg6[%c0_5, %c0_6] : memref<2x4xf32, #tpu.memory_space<vmem>>, vector<2x4xf32>
    tpu.vector_store %arg6[%c0_5, %c0_6], %6 {strides = array<i32>} : memref<2x4xf32, #tpu.memory_space<vmem>>, vector<2x4xf32>,
    %c0_i32_7 = arith.constant 0 : i32
    %8 = arith.cmpi eq, %arg1, %c0_i32_7 : i32
    %9 = arith.extui %8 : i1 to i32
    %c0_i32_8 = arith.constant 0 : i32
    %10 = arith.cmpi ne, %9, %c0_i32_8 : i32
    scf.if %10 {
      %c0_9 = arith.constant 0 : index
      %c0_10 = arith.constant 0 : index
      %11 = vector.load %arg6[%c0_9, %c0_10] : memref<2x4xf32, #tpu.memory_space<vmem>>, vector<2x4xf32>
      %cst_11 = arith.constant 3.906250e-03 : f32
      %12 = vector.broadcast %cst_11 : f32 to vector<2x4xf32>
      %13 = arith.mulf %11, %12 : vector<2x4xf32>
      %c0_12 = arith.constant 0 : index
      %c0_13 = arith.constant 0 : index
      %14 = vector.load %arg3[%c0_12, %c0_13] : memref<4x128xf32, #tpu.memory_space<vmem>>, vector<4x128xf32>
      %cst_14 = arith.constant dense<0.000000e+00> : vector<2x128xf32>
      %15 = tpu.matmul %13, %14, %cst_14 {dimension_numbers = #tpu.dot_dimension_numbers<[1], [0], [0], [1], [0, 0, 1, 1], [], []>} : vector<2x4xf32>, vector<4x128xf32>, vector<2x128xf32> -> vector<2x128xf32>
      %c0_15 = arith.constant 0 : index
      %c0_16 = arith.constant 0 : index
      %16 = vector.load %arg4[%c0_15, %c0_16] : memref<1x128xf32, #tpu.memory_space<vmem>>, vector<1x128xf32>
      %17 = vector.broadcast %16 : vector<1x128xf32> to vector<2x128xf32>
      %18 = arith.addf %15, %17 : vector<2x128xf32>
      %c0_17 = arith.constant 0 : index
      %c0_18 = arith.constant 0 : index
      %19 = vector.load %arg5[%c0_17, %c0_18] : memref<2x128xf32, #tpu.memory_space<vmem>>, vector<2x128xf32>
      tpu.vector_store %arg5[%c0_17, %c0_18], %18 {strides = array<i32>} : memref<2x128xf32, #tpu.memory_space<vmem>>, vector<2x128xf32>,
    } else {
    }
    return
  }
  func.func @transform_0(%arg0: i32, %arg1: i32) -> (i32, i32, i32) {
    %c0_i32 = arith.constant 0 : i32
    %c0_i32_0 = arith.constant 0 : i32
    return %arg0, %c0_i32, %arg1 : i32, i32, i32
  }
  func.func @transform_1(%arg0: i32, %arg1: i32) -> (i32, i32) {
    %c0_i32 = arith.constant 0 : i32
    %c0_i32_0 = arith.constant 0 : i32
    %c0_i32_1 = arith.constant 0 : i32
    return %c0_i32, %c0_i32_0 : i32, i32
  }
  func.func @transform_2(%arg0: i32, %arg1: i32) -> (i32, i32) {
    %c0_i32 = arith.constant 0 : i32
    %c0_i32_0 = arith.constant 0 : i32
    %c0_i32_1 = arith.constant 0 : i32
    return %c0_i32, %c0_i32_0 : i32, i32
  }
  func.func @transform_3(%arg0: i32, %arg1: i32) -> (i32, i32) {
    %c0_i32 = arith.constant 0 : i32
    %c0_i32_0 = arith.constant 0 : i32
    return %arg0, %c0_i32 : i32, i32
  }
}

</mosaic_0001>

<bundles_post_ra>
// kernel: tpu_custom_call.1
= control target key start
LH: loop header
LB: loop body
LE: loop exit
PB: predicated region body
PF: predicated region fallthrough
CT: control target
= control target key end

     0   :  { %8 = vsyncpa [#allocation4], 0  ;;  %s356_s0 = inlined_call_operand.hbm [shape: f32[2,4,256], index: 0, kind: input, shape index: {}]   ;;  %s357_s1 = inlined_call_operand.hbm [shape: f32[4,128], index: 1, kind: input, shape index: {}]   ;;  %s358_s2 = inlined_call_operand.vmem [shape: f32[1,128], index: 2, kind: input, shape index: {}]   ;;  %s359_s3 = inlined_call_operand.hbm [shape: f32[2,128], index: 3, kind: output, shape index: {}]  }
   0x1   :  { %9 = vsyncpa [#allocation7], 0 }
   0x2   :  { %10 = vsyncpa [#allocation5], 0  ;;  %s283_s12 = smov [#allocation3]   ;;  %s211_s16 = scalar_lea.hbm %s356_s0, 256 }
   0x3   :  { %s16_s13 = sshll.u32 %s283_s12, 4  ;;  %p212_p0 = scmp.ne.s32.totalorder %s356_s0, %s211_s16  ;;  %s17_s13 = int_to_ptr.vmem [resolvable:$true] %s16_s13 }
   0x4   :  { %p215_p1 = scmp.lt.u32.totalorder %s211_s16, %s356_s0 }
   0x6   :  { %p217_p2 = pnand %p215_p1, %p212_p0 }
   0x8   :  { %220 = shalt.err (!%p217_p2)
}
   0x9   :  { %s221_s21 = scalar_lea.vmem %s17_s13, 256  ;;  %p226_p4 = scmp.lt.s32.totalorder %s17_s13, %s17_s13 }
   0xa   :  { %p222_p3 = scmp.ne.s32.totalorder %s17_s13, %s221_s21  ;;  %p227_p5 = scmp.lt.s32.totalorder %s221_s21, %s221_s21 }
   0xc   :  { %p228_p6 = por %p227_p5, %p226_p4 }
   0xe   :  { %p229_p7 = pnand %p228_p6, %p222_p3 }
  0x10   :  { %232 = shalt.err (!%p229_p7)
}
  0x11   :  { %s284_s22 = smov 128   ;;  %s285_s23 = smov 8  }
  0x12   :  { %22 = dma.hbm_to_vmem [thread:$0]  %s356_s0, 256, %s17_s13, [#allocation4], %s284_s22, %s284_s22, %s285_s23  }
  0x13   :  { %s286_s26 = smov [#allocation6]   ;;  %s233_s30 = scalar_lea.hbm %s357_s1, 64 }
  0x14   :  { %s29_s27 = sshll.u32 %s286_s26, 4  ;;  %p234_p8 = scmp.ne.s32.totalorder %s357_s1, %s233_s30  ;;  %s30_s27 = int_to_ptr.vmem [resolvable:$true] %s29_s27 }
  0x15   :  { %p237_p9 = scmp.lt.u32.totalorder %s233_s30, %s357_s1 }
  0x17   :  { %p239_p10 = pnand %p237_p9, %p234_p8 }
  0x19   :  { %242 = shalt.err (!%p239_p10)
}
  0x1a   :  { %s243_s8 = scalar_lea.vmem %s30_s27, 64  ;;  %p248_p12 = scmp.lt.s32.totalorder %s30_s27, %s30_s27 }
  0x1b   :  { %p244_p11 = scmp.ne.s32.totalorder %s30_s27, %s243_s8  ;;  %p249_p13 = scmp.lt.s32.totalorder %s243_s8, %s243_s8 }
  0x1d   :  { %p250_p0 = por %p249_p13, %p248_p12 }
  0x1f   :  { %p251_p1 = pnand %p250_p0, %p244_p11 }
  0x21   :  { %254 = shalt.err (!%p251_p1)
}
  0x22   :  { %32 = dma.hbm_to_vmem [thread:$0]  %s357_s1, 64, %s30_s27, [#allocation7]  }
  0x23   :  { %277 = dma.done.wait [#allocation4], 256  }
  0x24   :  { %278 = vsyncadd [#allocation4], 4294967040 }
  0x25   :  { %279 = dma.done.wait [#allocation7], 64  }
  0x26   :  { %280 = vsyncadd [#allocation7], 4294967232  ;;  %vm56_vm0 = vcmask 1043456   ;;  %v48_v0 = vld [vmem:[#allocation3] sm:$0xff]  ;;  %v49_v1 = vld [vmem:[#allocation3 + $0x8] sm:$0xff]  ;;  %vm45_vm1 = vcmask 25600   ;;  %v69_v12 = vlaneseq }
  0x27   :  { %v52_v2 = vcombine.high %v48_v0, %v48_v0  ;;  %v57_v3 = vsel %vm56_vm0, %v48_v0, 0.0  ;;  %v53_v4 = vcombine.high %v49_v1, %v49_v1  ;;  %v62_v6 = vsel %vm56_vm0, %v49_v1, 0.0  ;;  %v90_v11 = vld [vmem:[#allocation6] sm:$0xf]  ;;  %v192_v25 = vld [vmem:[%s358_s2] ss:$0 sm:$0xff] }
  0x28   :  { %v287_v10 = vmov 0.0   ;;  %vm288_vm2 = vmmov 0   ;;  %v70_v13 = vand.u32 127, %v69_v12  ;;  %v72_v14 = vshrl.u32 %v69_v12, 7  ;;  %s289_s11 = smov [#allocation8]  }
  0x29   :  { %v58_v5 = vsel %vm56_vm0, %v52_v2, 0.0  ;;  %v63_v7 = vsel %vm56_vm0, %v53_v4, 0.0  ;;  %46 = vst.msk [vmem:[#allocation2] sm:$0x3] %vm45_vm1, %v287_v10  ;;  %197 = vmatprep.subr.mxu0 %v287_v10  ;;  %199 = vmatprep.mubr.msk.f32.mxu0 %vm288_vm2, %v287_v10  ;;  %vm79_vm3 = vcmask 1041409   ;;  %vm98_vm4 = vcmask 31744  }
  0x2a   :  { %v59_v8 = vadd.f32 %v58_v5, %v57_v3  ;;  %v64_v9 = vadd.f32 %v63_v7, %v62_v6  ;;  %198 = vmatpush3.msk.msra.mxu0 %vm56_vm0, %v90_v11  ;;  %v73_v16 = vsub.s32 %v70_v13, %v72_v14  ;;  %s182_s12 = sshll.u32 %s289_s11, 4  ;;  %s183_s12 = int_to_ptr.vmem [resolvable:$true] %s182_s12 }
  0x2b   :  { %s255_s13 = scalar_lea.vmem %s183_s12, 32  ;;  %p260_p3 = scmp.lt.s32.totalorder %s183_s12, %s183_s12 }
  0x2c   :  { %60 = vadd.xlane.f32.xlu0 %v59_v8  ;;  %p256_p2 = scmp.ne.s32.totalorder %s183_s12, %s255_s13  ;;  %p261_p4 = scmp.lt.s32.totalorder %s255_s13, %s255_s13 }
  0x2e   :  { %p262_p5 = por %p261_p4, %p260_p3 }
  0x30   :  { %65 = vadd.xlane.f32.xlu0 %v64_v9  ;;  %v47_v20 = vld [vmem:[#allocation2] sm:$0x3]  ;;  %p263_p6 = pnand %p262_p5, %p256_p2 }
  0xb9   :  { %v61_v15 = vpop.xlane.xlu0 %60 }
  0xba   :  { %v74_v18 = vrot.slane %v61_v15, %v73_v16 }
  0xbd   :  { %v66_v17 = vpop.xlane.xlu0 %65 }
  0xbe   :  { %v78_v19 = vrot.slane %v66_v17, %v73_v16 }
  0xc0   :  { %v80_v21 = vsel %vm79_vm3, %v78_v19, %v74_v18 }
  0xc1   :  { %v82_v22 = vadd.f32 %v80_v21, %v47_v20 }
  0xc3   :  { %84 = vst.msk [vmem:[#allocation2] sm:$0x3] %vm45_vm1, %v82_v22 }
  0xca   :  { %v88_v23 = vld [vmem:[#allocation2] sm:$0x3] }
  0xcb   :  { %v89_v24 = vmul.f32 0.00390625, %v88_v23 }
  0xcd   :  { %200 = vmatmul.mubr.msk.f32.vlgmr.msra.gmra.mrb[0].mxu0 %vm98_vm4, %v89_v24 }
 0x1a0   :  { %v171_v26 = vpop.f32.mrb[0].mxu0 }
 0x1a1   :  { %v172_v27 = vadd.f32 %v192_v25, %v171_v26  ;;  %v201_v28 = vpop.f32.mrb[1].mxu0 }
 0x1a3   :  { %175 = vst [vmem:[#allocation8] sm:$0x3] %v172_v27 }
 0x1a4   :  { %266 = shalt.err (!%p263_p6)
}
 0x1a5   :  { %s267_s16 = scalar_lea.hbm %s359_s3, 32 }
 0x1a6   :  { %p268_p7 = scmp.ne.s32.totalorder %s359_s3, %s267_s16  ;;  %p271_p8 = scmp.lt.u32.totalorder %s267_s16, %s359_s3 }
 0x1a8   :  { %p273_p9 = pnand %p271_p8, %p268_p7 }
 0x1aa   :  { %276 = shalt.err (!%p273_p9)
}
 0x1ab   :  { %185 = dma.vmem_to_hbm [thread:$0]  %s183_s12, 32, %s359_s3, [#allocation5]  }
 0x1ac   :  { %281 = dma.done.wait [#allocation5], 32  }
 0x1ad   :  { %282 = vsyncadd [#allocation5], 4294967264 }
 0x1ae   :  { %189 = vsyncpa [#allocation4], 1 }
 0x1af   :  { %190 = vsyncpa [#allocation7], 1 }
 0x1b0   :  { %191 = vsyncpa [#allocation5], 1 }

</bundles_post_ra>
